<compile_context>
chip_gen: v6e
topology: v6e:2x2x1
jax: 0.10.0
libtpu: 0.0.40
codegen_flags: <defaults>
</compile_context>

<pallas_src>
import jax
import jax.numpy as jnp
from jax.experimental import pallas as pl
from jax.experimental.pallas import tpu as pltpu

_DEFAULT_TILE_N = 4096  # rows per grid step (multiple of 16 for bf16 packing)


def _edge_disc_kernel(src_ref, dst_ref, w1_ref, b1_ref, w2_ref, b2_ref, out_ref):
    # Fold the concat into a single K = 2*emb_dim matmul on the MXU.
    x = jnp.concatenate([src_ref[...], dst_ref[...]], axis=-1)   # [tile_n, 2*emb_dim]
    # Linear1 (+bias, ReLU) with f32 accumulation regardless of input dtype.
    h = jnp.dot(x, w1_ref[...], preferred_element_type=jnp.float32)
    h = jnp.maximum(h + b1_ref[...], 0.0)                        # f32 epilogue (v5e-safe)
    # Linear2: cast activations to the weight dtype for the MXU, accumulate f32.
    out = jnp.dot(h.astype(w2_ref.dtype), w2_ref[...],
                  preferred_element_type=jnp.float32)
    out_ref[...] = (out + b2_ref[...]).astype(out_ref.dtype)


def prepare_params(params, compute_dtype=jnp.bfloat16):
    """One-time param prep: transpose PyTorch [out,in] weights, cast, reshape biases."""
    w1, b1, w2, b2 = params["w1"], params["b1"], params["w2"], params["b2"]
    return {
        "w1_t": jnp.transpose(w1).astype(compute_dtype),   # [2*emb_dim, emb_dim]
        "b1": b1.reshape(1, -1).astype(jnp.float32),        # [1, emb_dim]
        "w2_t": jnp.transpose(w2).astype(compute_dtype),    # [emb_dim, num_graphs]
        "b2": b2.reshape(1, -1).astype(jnp.float32),         # [1, num_graphs]
    }


def edge_type_discriminator(src_embs, dst_embs, prepped, *, tile_n=None,
                            out_dtype=jnp.float32):
    """src_embs, dst_embs: [N, emb_dim]. prepped: output of prepare_params.
    Returns [N, num_graphs] (float32, matching the PyTorch module)."""
    n, emb_dim = src_embs.shape
    w1_t, b1 = prepped["w1_t"], prepped["b1"]
    w2_t, b2 = prepped["w2_t"], prepped["b2"]
    num_graphs = w2_t.shape[1]
    compute_dtype = w1_t.dtype

    # Cast streaming inputs at the boundary (halves HBM read traffic in bf16).
    src = src_embs.astype(compute_dtype)
    dst = dst_embs.astype(compute_dtype)

    if tile_n is None:
        tile_n = _DEFAULT_TILE_N
    tile_n = min(tile_n, n)          # single full-extent block for small N
    grid = (pl.cdiv(n, tile_n),)

    row_spec = lambda cols: pl.BlockSpec((tile_n, cols), lambda i: (i, 0))
    resident = lambda arr: pl.BlockSpec(arr.shape, lambda i: (0, 0))

    return pl.pallas_call(
        _edge_disc_kernel,
        out_shape=jax.ShapeDtypeStruct((n, num_graphs), out_dtype),
        grid=grid,
        in_specs=[
            row_spec(emb_dim),      # src: streamed row tiles
            row_spec(emb_dim),      # dst: streamed row tiles
            resident(w1_t),         # weights/biases: VMEM-resident across grid
            resident(b1),
            resident(w2_t),
            resident(b2),
        ],
        out_specs=row_spec(num_graphs),
        compiler_params=pltpu.CompilerParams(
            dimension_semantics=("parallel",)),   # megacore row split on v7x
    )(src, dst, w1_t, b1, w2_t, b2)


def init_params(key, num_graphs, emb_dim):
    """Deterministic synthetic params with PyTorch Linear shapes."""
    k1, k2, k3, k4 = jax.random.split(key, 4)
    w1 = jax.random.normal(k1, (emb_dim, 2 * emb_dim), jnp.float32) * 0.1
    b1 = jax.random.normal(k2, (emb_dim,), jnp.float32) * 0.1
    w2 = jax.random.normal(k3, (num_graphs, emb_dim), jnp.float32) * 0.1
    b2 = jax.random.normal(k4, (emb_dim if False else num_graphs,), jnp.float32) * 0.1
    return {"w1": w1, "b1": b1, "w2": w2, "b2": b2}


def _reference(src, dst, p, cast_dtype=None):
    """Pure-JAX reference. cast_dtype mimics the kernel's low-precision path."""
    f32 = jnp.float32
    cast = ((lambda a: a.astype(cast_dtype).astype(f32))
            if cast_dtype is not None else (lambda a: a))
    edge_vec = jnp.concatenate([cast(src), cast(dst)], axis=1)
    h = jnp.maximum(edge_vec @ cast(p["w1"]).T + p["b1"], 0.0)
    return cast(h) @ cast(p["w2"]).T + p["b2"]


if __name__ == "__main__":
    num_graphs = 4
    emb_dim = 32

    key = jax.random.PRNGKey(0)
    kp, ks, kd = jax.random.split(key, 3)
    params = init_params(kp, num_graphs, emb_dim)

    # --- 1) Exact f32 path, tiny single-tile case: matches PyTorch math tightly.
    n_small = 8
    src = jax.random.normal(ks, (n_small, emb_dim), jnp.float32)
    dst = jax.random.normal(kd, (n_small, emb_dim), jnp.float32)
    prep_f32 = prepare_params(params, compute_dtype=jnp.float32)
    out = jax.block_until_ready(edge_type_discriminator(src, dst, prep_f32))
    ref = _reference(src, dst, params)
    assert out.shape == (n_small, num_graphs)
    assert jnp.allclose(out, ref, atol=1e-5, rtol=1e-5)

    # --- 2) bf16 fast path, multi-tile grid with a partial last block.
    n_big = 200
    ks2, kd2 = jax.random.split(jax.random.PRNGKey(1), 2)
    src_b = jax.random.normal(ks2, (n_big, emb_dim), jnp.float32)
    dst_b = jax.random.normal(kd2, (n_big, emb_dim), jnp.float32)
    prep_bf16 = prepare_params(params, compute_dtype=jnp.bfloat16)
    out_b = jax.block_until_ready(
        edge_type_discriminator(src_b, dst_b, prep_bf16, tile_n=64))
    ref_b = _reference(src_b, dst_b, params, cast_dtype=jnp.bfloat16)
    assert out_b.shape == (n_big, num_graphs)
    assert jnp.allclose(out_b, ref_b, atol=2e-2, rtol=2e-2)

    print("KERNEL_OK")
</pallas_src>

<mosaic_0001>
module attributes {stable_mosaic.version = 11 : i64} {
  func.func @_edge_disc_kernel(%arg0: i32, %arg1: memref<8x32xf32, #tpu.memory_space<vmem>>, %arg2: memref<8x32xf32, #tpu.memory_space<vmem>>, %arg3: memref<64x32xf32, #tpu.memory_space<vmem>>, %arg4: memref<1x32xf32, #tpu.memory_space<vmem>>, %arg5: memref<32x4xf32, #tpu.memory_space<vmem>>, %arg6: memref<1x4xf32, #tpu.memory_space<vmem>>, %arg7: memref<8x4xf32, #tpu.memory_space<vmem>>) attributes {dimension_semantics = [#tpu.dimension_semantics<parallel>], iteration_bounds = array<i64: 1>, scalar_prefetch = 0 : i64, scratch_operands = 0 : i64, tpu.core_type = #tpu.core_type<tc>, window_params = [{transform_indices = @transform_0, window_bounds = array<i64: 8, 32>}, {transform_indices = @transform_1, window_bounds = array<i64: 8, 32>}, {pipeline_mode = #tpu.pipeline_mode<synchronous>, transform_indices = @transform_2, window_bounds = array<i64: 64, 32>}, {pipeline_mode = #tpu.pipeline_mode<synchronous>, transform_indices = @transform_3, window_bounds = array<i64: 1, 32>}, {pipeline_mode = #tpu.pipeline_mode<synchronous>, transform_indices = @transform_4, window_bounds = array<i64: 32, 4>}, {pipeline_mode = #tpu.pipeline_mode<synchronous>, transform_indices = @transform_5, window_bounds = array<i64: 1, 4>}, {transform_indices = @transform_6, window_bounds = array<i64: 8, 4>}]} {
    %c0 = arith.constant 0 : index
    %c0_0 = arith.constant 0 : index
    %0 = vector.load %arg1[%c0, %c0_0] : memref<8x32xf32, #tpu.memory_space<vmem>>, vector<8x32xf32>
    %c0_1 = arith.constant 0 : index
    %c0_2 = arith.constant 0 : index
    %1 = vector.load %arg2[%c0_1, %c0_2] : memref<8x32xf32, #tpu.memory_space<vmem>>, vector<8x32xf32>
    %2 = tpu.concatenate %0, %1 in 1 : vector<8x32xf32>, vector<8x32xf32> -> vector<8x64xf32>
    %c0_3 = arith.constant 0 : index
    %c0_4 = arith.constant 0 : index
    %3 = vector.load %arg3[%c0_3, %c0_4] : memref<64x32xf32, #tpu.memory_space<vmem>>, vector<64x32xf32>
    %cst = arith.constant dense<0.000000e+00> : vector<8x32xf32>
    %4 = tpu.matmul %2, %3, %cst {dimension_numbers = #tpu.dot_dimension_numbers<[1], [0], [0], [1], [0, 0, 1, 1], [], []>} : vector<8x64xf32>, vector<64x32xf32>, vector<8x32xf32> -> vector<8x32xf32>
    %c0_5 = arith.constant 0 : index
    %c0_6 = arith.constant 0 : index
    %5 = vector.load %arg4[%c0_5, %c0_6] : memref<1x32xf32, #tpu.memory_space<vmem>>, vector<1x32xf32>
    %6 = vector.broadcast %5 : vector<1x32xf32> to vector<8x32xf32>
    %7 = arith.addf %4, %6 : vector<8x32xf32>
    %cst_7 = arith.constant 0.000000e+00 : f32
    %8 = vector.broadcast %cst_7 : f32 to vector<8x32xf32>
    %9 = arith.maximumf %7, %8 : vector<8x32xf32>
    %c0_8 = arith.constant 0 : index
    %c0_9 = arith.constant 0 : index
    %10 = vector.load %arg5[%c0_8, %c0_9] : memref<32x4xf32, #tpu.memory_space<vmem>>, vector<32x4xf32>
    %cst_10 = arith.constant dense<0.000000e+00> : vector<8x4xf32>
    %11 = tpu.matmul %9, %10, %cst_10 {dimension_numbers = #tpu.dot_dimension_numbers<[1], [0], [0], [1], [0, 0, 1, 1], [], []>} : vector<8x32xf32>, vector<32x4xf32>, vector<8x4xf32> -> vector<8x4xf32>
    %c0_11 = arith.constant 0 : index
    %c0_12 = arith.constant 0 : index
    %12 = vector.load %arg6[%c0_11, %c0_12] : memref<1x4xf32, #tpu.memory_space<vmem>>, vector<1x4xf32>
    %13 = vector.broadcast %12 : vector<1x4xf32> to vector<8x4xf32>
    %14 = arith.addf %11, %13 : vector<8x4xf32>
    %c0_13 = arith.constant 0 : index
    %c0_14 = arith.constant 0 : index
    %15 = vector.load %arg7[%c0_13, %c0_14] : memref<8x4xf32, #tpu.memory_space<vmem>>, vector<8x4xf32>
    tpu.vector_store %arg7[%c0_13, %c0_14], %14 {strides = array<i32>} : memref<8x4xf32, #tpu.memory_space<vmem>>, vector<8x4xf32>,
    return
  }
  func.func @transform_0(%arg0: i32) -> (i32, i32) {
    %c0_i32 = arith.constant 0 : i32
    %c0_i32_0 = arith.constant 0 : i32
    return %arg0, %c0_i32 : i32, i32
  }
  func.func @transform_1(%arg0: i32) -> (i32, i32) {
    %c0_i32 = arith.constant 0 : i32
    %c0_i32_0 = arith.constant 0 : i32
    return %arg0, %c0_i32 : i32, i32
  }
  func.func @transform_2(%arg0: i32) -> (i32, i32) {
    %c0_i32 = arith.constant 0 : i32
    %c0_i32_0 = arith.constant 0 : i32
    %c0_i32_1 = arith.constant 0 : i32
    return %c0_i32, %c0_i32_0 : i32, i32
  }
  func.func @transform_3(%arg0: i32) -> (i32, i32) {
    %c0_i32 = arith.constant 0 : i32
    %c0_i32_0 = arith.constant 0 : i32
    %c0_i32_1 = arith.constant 0 : i32
    return %c0_i32, %c0_i32_0 : i32, i32
  }
  func.func @transform_4(%arg0: i32) -> (i32, i32) {
    %c0_i32 = arith.constant 0 : i32
    %c0_i32_0 = arith.constant 0 : i32
    %c0_i32_1 = arith.constant 0 : i32
    return %c0_i32, %c0_i32_0 : i32, i32
  }
  func.func @transform_5(%arg0: i32) -> (i32, i32) {
    %c0_i32 = arith.constant 0 : i32
    %c0_i32_0 = arith.constant 0 : i32
    %c0_i32_1 = arith.constant 0 : i32
    return %c0_i32, %c0_i32_0 : i32, i32
  }
  func.func @transform_6(%arg0: i32) -> (i32, i32) {
    %c0_i32 = arith.constant 0 : i32
    %c0_i32_0 = arith.constant 0 : i32
    return %arg0, %c0_i32 : i32, i32
  }
}

</mosaic_0001>

<bundles_post_ra>
// kernel: tpu_custom_call.1
= control target key start
LH: loop header
LB: loop body
LE: loop exit
PB: predicated region body
PF: predicated region fallthrough
CT: control target
= control target key end

     0   :  { %v262_v1 = vmov 0.0   ;;  %vm263_vm0 = vmmov 0   ;;  %s264_s27 = smov 32   ;;  %vm29_vm1 = vcmask 261120   ;;  %vm46_vm2 = vcmask 523264   ;;  %s353_s1 = inlined_call_operand.vmem [shape: f32[8,32], index: 1, kind: input, shape index: {}]   ;;  %s354_s2 = inlined_call_operand.vmem [shape: f32[64,32], index: 2, kind: input, shape index: {}]   ;;  %s355_s4 = inlined_call_operand.vmem [shape: f32[32,4], index: 4, kind: input, shape index: {}]   ;;  %s356_s0 = inlined_call_operand.vmem [shape: f32[8,32], index: 0, kind: input, shape index: {}]   ;;  %s357_s3 = inlined_call_operand.vmem [shape: f32[1,32], index: 3, kind: input, shape index: {}]   ;;  %s358_s5 = inlined_call_operand.vmem [shape: f32[1,4], index: 5, kind: input, shape index: {}]   ;;  %s359_s6 = inlined_call_operand.vmem [shape: f32[8,4], index: 6, kind: output, shape index: {}]  }
   0x1   :  { %v24_v0 = vld [vmem:[%s353_s1] sm:$0xff]  ;;  %229 = vmatprep.subr.mxu0 %v262_v1  ;;  %v38_v2 = vld [vmem:[%s354_s2 + $0x38] sm:$0xff]  ;;  %v37_v3 = vld [vmem:[%s354_s2 + $0x30] sm:$0xff]  ;;  %245 = vmatprep.mubr.msk.f32.mxu0 %vm263_vm0, %v262_v1  ;;  %vm205_vm3 = vcmask 31744  }
   0x2   :  { %26 = vrot.lane.b32.xlu0 %v24_v0, %s264_s27  ;;  %230 = vmatpush3.msra.mxu0 %v38_v2  ;;  %v36_v4 = vld [vmem:[%s354_s2 + $0x28] sm:$0xff]  ;;  %v124_v5 = vld [vmem:[%s355_s4 + $0x18] sm:$0xff]  ;;  %v35_v6 = vld [vmem:[%s354_s2 + $0x20] sm:$0xff] }
   0x3   :  { %231 = vmatprep.subr.mxu0 %v262_v1  ;;  %248 = vmatprep.subr.mxu1 %v262_v1  ;;  %v34_v7 = vld [vmem:[%s354_s2 + $0x18] sm:$0xff]  ;;  %v33_v8 = vld [vmem:[%s354_s2 + $0x10] sm:$0xff]  ;;  %v32_v9 = vld [vmem:[%s354_s2 + $0x8] sm:$0xff] }
   0x4   :  { %232 = vmatpush3.msra.mxu0 %v37_v3  ;;  %256 = vmatprep.mubr.msk.f32.mxu1 %vm263_vm0, %v262_v1  ;;  %v31_v10 = vld [vmem:[%s354_s2] sm:$0xff]  ;;  %v123_v14 = vld [vmem:[%s355_s4 + $0x10] sm:$0xff]  ;;  %v122_v15 = vld [vmem:[%s355_s4 + $0x8] sm:$0xff] }
   0x5   :  { %233 = vmatprep.subr.mxu0 %v262_v1  ;;  %249 = vmatpush3.msra.mxu1 %v124_v5  ;;  %v23_v11 = vld [vmem:[%s356_s0] sm:$0xff] }
   0x6   :  { %234 = vmatpush3.msra.mxu0 %v36_v4  ;;  %250 = vmatprep.subr.mxu1 %v262_v1  ;;  %v121_v16 = vld [vmem:[%s355_s4] sm:$0xff] }
   0x7   :  { %235 = vmatprep.subr.mxu0 %v262_v1  ;;  %251 = vmatpush3.msra.mxu1 %v123_v14  ;;  %v211_v17 = vld [vmem:[%s357_s3] ss:$0 sm:$0xff] }
   0x8   :  { %236 = vmatpush3.msra.mxu0 %v35_v6  ;;  %252 = vmatprep.subr.mxu1 %v262_v1  ;;  %v213_v22 = vld [vmem:[%s358_s5] ss:$0 sm:$0xff] }
   0x9   :  { %237 = vmatprep.subr.mxu0 %v262_v1  ;;  %253 = vmatpush3.msra.mxu1 %v122_v15 }
   0xa   :  { %238 = vmatpush3.msra.mxu0 %v34_v7  ;;  %254 = vmatprep.subr.mxu1 %v262_v1 }
   0xb   :  { %239 = vmatprep.subr.mxu0 %v262_v1  ;;  %255 = vmatpush3.msra.mxu1 %v121_v16 }
   0xc   :  { %240 = vmatpush3.msra.mxu0 %v33_v8 }
   0xd   :  { %241 = vmatprep.subr.mxu0 %v262_v1 }
   0xe   :  { %242 = vmatpush3.msra.mxu0 %v32_v9 }
   0xf   :  { %243 = vmatprep.subr.mxu0 %v262_v1 }
  0x10   :  { %244 = vmatpush3.msra.mxu0 %v31_v10 }
  0x74   :  { %v27_v12 = vpop.permute.xlu0 %26 }
  0x75   :  { %v30_v13 = vsel %vm29_vm1, %v23_v11, %v27_v12 }
  0x76   :  { %246 = vmatmul.mubr.msk.f32.vlgmr.msra.gmra.mxu0 %vm46_vm2, %v30_v13 }
 0x136   :  { %v116_v18 = vpop.f32.mrf.mxu0 }
 0x137   :  { %v117_v19 = vadd.f32 %v211_v17, %v116_v18 }
 0x138   :  { %v247_v20 = vpop.f32.mrf.mxu0 }
 0x139   :  { %v120_v21 = vmax.f32 %v117_v19, 0.0 }
 0x13b   :  { %257 = vmatmul.mubr.msk.f32.vlgmr.msra.gmra.mxu1 %vm29_vm1, %v120_v21 }
 0x1fb   :  { %v201_v23 = vpop.f32.mrf.mxu1 }
 0x1fc   :  { %v202_v24 = vadd.f32 %v213_v22, %v201_v23 }
 0x1fd   :  { %v258_v25 = vpop.f32.mrf.mxu1 }
 0x1fe   :  { %206 = vst.msk [vmem:[%s359_s6] sm:$0xff] %vm205_vm3, %v202_v24 }

</bundles_post_ra>
